<compile_context>
chip_gen: v5e
topology: v5e:2x2
jax: 0.10.0
libtpu: 0.0.40
codegen_flags: <defaults>
</compile_context>

<pallas_src>
import jax
import jax.numpy as jnp
import numpy as np
from jax.experimental import pallas as pl
from jax.experimental.pallas import tpu as pltpu

NEG = -1.0e30  # padded lanes/rows carry this; ReLU clamps them to exact 0.


# ---------------------------------------------------------------------------
# Fused Pallas kernel: whole conv stack, one grid step per batch element
# ---------------------------------------------------------------------------
def _make_fused_kernel(cfgs, seg):
    """cfgs: static tuple of (K, pad, relu) per layer."""
    n_layers = len(cfgs)

    def kernel(*refs):
        x_ref = refs[0]                    # (1, Cp, seg) zero-padded input slab
        o_ref = refs[1 + 2 * n_layers]     # (1, Cp, seg) output slab

        a = x_ref[0]                       # (Cp, seg) f32, borders exactly 0

        for i, (K, pad, relu) in enumerate(cfgs):
            w_ref = refs[1 + 2 * i]        # (K, Cp, Cp)  BN scale folded in
            s_ref = refs[2 + 2 * i]        # (Cp, seg)    bias/shift, NEG on pads

            acc = s_ref[...]               # bias already broadcast host-side
            for t in range(K):
                # rolled[:, c] = a[:, c - pad + t]  (pltpu.roll == jnp.roll)
                sh = (pad - t) % seg
                rolled = a if sh == 0 else pltpu.roll(a, shift=sh, axis=1)
                acc = acc + jnp.dot(w_ref[t], rolled,
                                    preferred_element_type=jnp.float32)
            # ReLU also restores exact zeros on padded lanes/rows (NEG shift).
            a = jnp.maximum(acc, 0.0) if relu else acc

        o_ref[0] = a.astype(o_ref.dtype)   # full-width lane-dense store

    return kernel


def regression_model1_forward(x, params):
    """x: (B, C0, L) float32.  params: list of dicts with
    'w' (C_out, C_in, K), 'scale' (C_out,), 'shift' (C_out,), 'relu' bool."""
    B, C0, L = x.shape
    chans = [C0] + [p["w"].shape[0] for p in params]
    Cp = max(8, ((max(chans) + 7) // 8) * 8)          # channels -> 8-sublane pad
    pads = [(p["w"].shape[-1] - 1) // 2 for p in params]
    pad_max = max(pads)
    pos = pad_max                                      # data starts at this lane
    seg = ((L + 2 * pad_max + 127) // 128) * 128       # 128-aligned lane segment
    assert pos + L + pad_max <= seg

    cfgs = tuple((p["w"].shape[-1], pads[i], bool(p["relu"]))
                 for i, p in enumerate(params))

    # ---- host/XLA-side layout prep (tiny; keeps every in-kernel move aligned)
    xp = jnp.zeros((B, Cp, seg), jnp.float32).at[:, :C0, pos:pos + L].set(
        x.astype(jnp.float32))

    args = [xp]
    in_specs = [pl.BlockSpec((1, Cp, seg), lambda b: (b, 0, 0))]
    for i, p in enumerate(params):
        C_out, C_in, K = p["w"].shape
        wf = p["w"] * p["scale"][:, None, None]                  # fold BN scale
        wt = jnp.zeros((K, Cp, Cp), jnp.float32).at[:, :C_out, :C_in].set(
            jnp.transpose(wf, (2, 0, 1)))                        # tap-major
        if p["relu"]:
            s_full = jnp.full((Cp, seg), NEG, jnp.float32).at[
                :C_out, pos:pos + L].set(p["shift"][:, None])
        else:
            s_full = jnp.zeros((Cp, seg), jnp.float32).at[:C_out, :].set(
                p["shift"][:, None])
        args += [wt, s_full]
        in_specs += [pl.BlockSpec((K, Cp, Cp), lambda b: (0, 0, 0)),
                     pl.BlockSpec((Cp, seg), lambda b: (0, 0))]

    out = pl.pallas_call(
        _make_fused_kernel(cfgs, seg),
        grid=(B,),
        in_specs=in_specs,
        out_specs=pl.BlockSpec((1, Cp, seg), lambda b: (b, 0, 0)),
        out_shape=jax.ShapeDtypeStruct((B, Cp, seg), jnp.float32),
        compiler_params=pltpu.CompilerParams(
            dimension_semantics=("parallel",)),
    )(*args)

    C_last = params[-1]["w"].shape[0]
    return out[:, :C_last, pos:pos + L]


# ---------------------------------------------------------------------------
# Parameters (deterministic synthetic, matching RegressionModel1 shapes)
# ---------------------------------------------------------------------------
def init_params(key, data_channels, out_channels, kernel_size):
    if len(kernel_size) == 1:
        kernel_size = kernel_size * len(out_channels)
    assert len(kernel_size) == len(out_channels)
    eps = 1e-5
    params = []
    in_ch = data_channels
    for i, out_ch in enumerate(out_channels):
        K = kernel_size[i]
        key, kw, kb, kg, kbe, km, kv = jax.random.split(key, 7)
        fan_in = in_ch * K
        bound = 1.0 / np.sqrt(fan_in)
        w = jax.random.uniform(kw, (out_ch, in_ch, K), jnp.float32, -bound, bound)
        b = jax.random.uniform(kb, (out_ch,), jnp.float32, -bound, bound)
        is_last = (i == len(out_channels) - 1)
        if not is_last:
            # BatchNorm1d (eval mode) running stats / affine params.
            gamma = jax.random.uniform(kg, (out_ch,), jnp.float32, 0.5, 1.5)
            beta = jax.random.normal(kbe, (out_ch,), jnp.float32) * 0.1
            mean = jax.random.normal(km, (out_ch,), jnp.float32) * 0.1
            var = jax.random.uniform(kv, (out_ch,), jnp.float32, 0.5, 1.5)
            scale = gamma / jnp.sqrt(var + eps)
            shift = beta + (b - mean) * scale
        else:
            scale = jnp.ones((out_ch,), jnp.float32)
            shift = b
        params.append(dict(w=w, scale=scale, shift=shift, relu=not is_last))
        in_ch = out_ch
    return params


def forward_reference(x, params):
    """Pure-JAX reference (lax.conv) for correctness checking."""
    for p in params:
        K = p["w"].shape[-1]
        pad = (K - 1) // 2
        y = jax.lax.conv_general_dilated(
            x, p["w"], window_strides=(1,), padding=[(pad, pad)],
            dimension_numbers=("NCH", "OIH", "NCH"))
        y = y * p["scale"][None, :, None] + p["shift"][None, :, None]
        x = jnp.maximum(y, 0.0) if p["relu"] else y
    return x


# ---------------------------------------------------------------------------
if __name__ == "__main__":
    key = jax.random.PRNGKey(0)
    key, kx, kp = jax.random.split(key, 3)

    # RegressionModel1(data_channels=4, out_channels=[8, 8, 4],
    #                  kernel_size=[13], input_length=64,
    #                  batch_norm=True, max_pool=False)
    B, data_channels, L = 2, 4, 64
    out_channels = [8, 8, 4]
    kernel_size = [13]

    x = jax.random.normal(kx, (B, data_channels, L), jnp.float32)
    params = init_params(kp, data_channels, out_channels, kernel_size)

    y = regression_model1_forward(x, params)
    y = jax.block_until_ready(y)

    y_ref = forward_reference(x, params)
    np.testing.assert_allclose(np.asarray(y), np.asarray(y_ref),
                               rtol=1e-4, atol=1e-4)

    print("KERNEL_OK")
</pallas_src>

<mosaic_0001>
module attributes {stable_mosaic.version = 11 : i64} {
  func.func @kernel(%arg0: i32, %arg1: memref<1x8x128xf32, #tpu.memory_space<vmem>>, %arg2: memref<13x8x8xf32, #tpu.memory_space<vmem>>, %arg3: memref<8x128xf32, #tpu.memory_space<vmem>>, %arg4: memref<13x8x8xf32, #tpu.memory_space<vmem>>, %arg5: memref<8x128xf32, #tpu.memory_space<vmem>>, %arg6: memref<13x8x8xf32, #tpu.memory_space<vmem>>, %arg7: memref<8x128xf32, #tpu.memory_space<vmem>>, %arg8: memref<1x8x128xf32, #tpu.memory_space<vmem>>) attributes {dimension_semantics = [#tpu.dimension_semantics<parallel>], iteration_bounds = array<i64: 2>, scalar_prefetch = 0 : i64, scratch_operands = 0 : i64, tpu.core_type = #tpu.core_type<tc>, window_params = [{transform_indices = @transform_0, window_bounds = array<i64: 1, 8, 128>}, {pipeline_mode = #tpu.pipeline_mode<synchronous>, transform_indices = @transform_1, window_bounds = array<i64: 13, 8, 8>}, {pipeline_mode = #tpu.pipeline_mode<synchronous>, transform_indices = @transform_2, window_bounds = array<i64: 8, 128>}, {pipeline_mode = #tpu.pipeline_mode<synchronous>, transform_indices = @transform_3, window_bounds = array<i64: 13, 8, 8>}, {pipeline_mode = #tpu.pipeline_mode<synchronous>, transform_indices = @transform_4, window_bounds = array<i64: 8, 128>}, {pipeline_mode = #tpu.pipeline_mode<synchronous>, transform_indices = @transform_5, window_bounds = array<i64: 13, 8, 8>}, {pipeline_mode = #tpu.pipeline_mode<synchronous>, transform_indices = @transform_6, window_bounds = array<i64: 8, 128>}, {transform_indices = @transform_7, window_bounds = array<i64: 1, 8, 128>}]} {
    %c0 = arith.constant 0 : index
    %c0_0 = arith.constant 0 : index
    %c0_1 = arith.constant 0 : index
    %0 = vector.load %arg1[%c0, %c0_0, %c0_1] : memref<1x8x128xf32, #tpu.memory_space<vmem>>, vector<1x8x128xf32>
    %1 = vector.shape_cast %0 : vector<1x8x128xf32> to vector<8x128xf32>
    %c0_2 = arith.constant 0 : index
    %c0_3 = arith.constant 0 : index
    %2 = vector.load %arg3[%c0_2, %c0_3] : memref<8x128xf32, #tpu.memory_space<vmem>>, vector<8x128xf32>
    %c6_i32 = arith.constant 6 : i32
    %3 = tpu.dynamic_rotate %1 by %c6_i32 dim 1 : vector<8x128xf32>, i32 -> vector<8x128xf32>
    %c0_4 = arith.constant 0 : index
    %c0_5 = arith.constant 0 : index
    %c0_6 = arith.constant 0 : index
    %4 = vector.load %arg2[%c0_4, %c0_5, %c0_6] : memref<13x8x8xf32, #tpu.memory_space<vmem>>, vector<1x8x8xf32>
    %5 = vector.shape_cast %4 : vector<1x8x8xf32> to vector<8x8xf32>
    %cst = arith.constant dense<0.000000e+00> : vector<8x128xf32>
    %6 = tpu.matmul %5, %3, %cst {dimension_numbers = #tpu.dot_dimension_numbers<[1], [0], [0], [1], [0, 0, 1, 1], [], []>} : vector<8x8xf32>, vector<8x128xf32>, vector<8x128xf32> -> vector<8x128xf32>
    %7 = arith.addf %2, %6 : vector<8x128xf32>
    %c5_i32 = arith.constant 5 : i32
    %8 = tpu.dynamic_rotate %1 by %c5_i32 dim 1 : vector<8x128xf32>, i32 -> vector<8x128xf32>
    %c1 = arith.constant 1 : index
    %c0_7 = arith.constant 0 : index
    %c0_8 = arith.constant 0 : index
    %9 = vector.load %arg2[%c1, %c0_7, %c0_8] : memref<13x8x8xf32, #tpu.memory_space<vmem>>, vector<1x8x8xf32>
    %10 = vector.shape_cast %9 : vector<1x8x8xf32> to vector<8x8xf32>
    %cst_9 = arith.constant dense<0.000000e+00> : vector<8x128xf32>
    %11 = tpu.matmul %10, %8, %cst_9 {dimension_numbers = #tpu.dot_dimension_numbers<[1], [0], [0], [1], [0, 0, 1, 1], [], []>} : vector<8x8xf32>, vector<8x128xf32>, vector<8x128xf32> -> vector<8x128xf32>
    %12 = arith.addf %7, %11 : vector<8x128xf32>
    %c4_i32 = arith.constant 4 : i32
    %13 = tpu.dynamic_rotate %1 by %c4_i32 dim 1 : vector<8x128xf32>, i32 -> vector<8x128xf32>
    %c2 = arith.constant 2 : index
    %c0_10 = arith.constant 0 : index
    %c0_11 = arith.constant 0 : index
    %14 = vector.load %arg2[%c2, %c0_10, %c0_11] : memref<13x8x8xf32, #tpu.memory_space<vmem>>, vector<1x8x8xf32>
    %15 = vector.shape_cast %14 : vector<1x8x8xf32> to vector<8x8xf32>
    %cst_12 = arith.constant dense<0.000000e+00> : vector<8x128xf32>
    %16 = tpu.matmul %15, %13, %cst_12 {dimension_numbers = #tpu.dot_dimension_numbers<[1], [0], [0], [1], [0, 0, 1, 1], [], []>} : vector<8x8xf32>, vector<8x128xf32>, vector<8x128xf32> -> vector<8x128xf32>
    %17 = arith.addf %12, %16 : vector<8x128xf32>
    %c3_i32 = arith.constant 3 : i32
    %18 = tpu.dynamic_rotate %1 by %c3_i32 dim 1 : vector<8x128xf32>, i32 -> vector<8x128xf32>
    %c3 = arith.constant 3 : index
    %c0_13 = arith.constant 0 : index
    %c0_14 = arith.constant 0 : index
    %19 = vector.load %arg2[%c3, %c0_13, %c0_14] : memref<13x8x8xf32, #tpu.memory_space<vmem>>, vector<1x8x8xf32>
    %20 = vector.shape_cast %19 : vector<1x8x8xf32> to vector<8x8xf32>
    %cst_15 = arith.constant dense<0.000000e+00> : vector<8x128xf32>
    %21 = tpu.matmul %20, %18, %cst_15 {dimension_numbers = #tpu.dot_dimension_numbers<[1], [0], [0], [1], [0, 0, 1, 1], [], []>} : vector<8x8xf32>, vector<8x128xf32>, vector<8x128xf32> -> vector<8x128xf32>
    %22 = arith.addf %17, %21 : vector<8x128xf32>
    %c2_i32 = arith.constant 2 : i32
    %23 = tpu.dynamic_rotate %1 by %c2_i32 dim 1 : vector<8x128xf32>, i32 -> vector<8x128xf32>
    %c4 = arith.constant 4 : index
    %c0_16 = arith.constant 0 : index
    %c0_17 = arith.constant 0 : index
    %24 = vector.load %arg2[%c4, %c0_16, %c0_17] : memref<13x8x8xf32, #tpu.memory_space<vmem>>, vector<1x8x8xf32>
    %25 = vector.shape_cast %24 : vector<1x8x8xf32> to vector<8x8xf32>
    %cst_18 = arith.constant dense<0.000000e+00> : vector<8x128xf32>
    %26 = tpu.matmul %25, %23, %cst_18 {dimension_numbers = #tpu.dot_dimension_numbers<[1], [0], [0], [1], [0, 0, 1, 1], [], []>} : vector<8x8xf32>, vector<8x128xf32>, vector<8x128xf32> -> vector<8x128xf32>
    %27 = arith.addf %22, %26 : vector<8x128xf32>
    %c1_i32 = arith.constant 1 : i32
    %28 = tpu.dynamic_rotate %1 by %c1_i32 dim 1 : vector<8x128xf32>, i32 -> vector<8x128xf32>
    %c5 = arith.constant 5 : index
    %c0_19 = arith.constant 0 : index
    %c0_20 = arith.constant 0 : index
    %29 = vector.load %arg2[%c5, %c0_19, %c0_20] : memref<13x8x8xf32, #tpu.memory_space<vmem>>, vector<1x8x8xf32>
    %30 = vector.shape_cast %29 : vector<1x8x8xf32> to vector<8x8xf32>
    %cst_21 = arith.constant dense<0.000000e+00> : vector<8x128xf32>
    %31 = tpu.matmul %30, %28, %cst_21 {dimension_numbers = #tpu.dot_dimension_numbers<[1], [0], [0], [1], [0, 0, 1, 1], [], []>} : vector<8x8xf32>, vector<8x128xf32>, vector<8x128xf32> -> vector<8x128xf32>
    %32 = arith.addf %27, %31 : vector<8x128xf32>
    %c6 = arith.constant 6 : index
    %c0_22 = arith.constant 0 : index
    %c0_23 = arith.constant 0 : index
    %33 = vector.load %arg2[%c6, %c0_22, %c0_23] : memref<13x8x8xf32, #tpu.memory_space<vmem>>, vector<1x8x8xf32>
    %34 = vector.shape_cast %33 : vector<1x8x8xf32> to vector<8x8xf32>
    %cst_24 = arith.constant dense<0.000000e+00> : vector<8x128xf32>
    %35 = tpu.matmul %34, %1, %cst_24 {dimension_numbers = #tpu.dot_dimension_numbers<[1], [0], [0], [1], [0, 0, 1, 1], [], []>} : vector<8x8xf32>, vector<8x128xf32>, vector<8x128xf32> -> vector<8x128xf32>
    %36 = arith.addf %32, %35 : vector<8x128xf32>
    %c127_i32 = arith.constant 127 : i32
    %37 = tpu.dynamic_rotate %1 by %c127_i32 dim 1 : vector<8x128xf32>, i32 -> vector<8x128xf32>
    %c7 = arith.constant 7 : index
    %c0_25 = arith.constant 0 : index
    %c0_26 = arith.constant 0 : index
    %38 = vector.load %arg2[%c7, %c0_25, %c0_26] : memref<13x8x8xf32, #tpu.memory_space<vmem>>, vector<1x8x8xf32>
    %39 = vector.shape_cast %38 : vector<1x8x8xf32> to vector<8x8xf32>
    %cst_27 = arith.constant dense<0.000000e+00> : vector<8x128xf32>
    %40 = tpu.matmul %39, %37, %cst_27 {dimension_numbers = #tpu.dot_dimension_numbers<[1], [0], [0], [1], [0, 0, 1, 1], [], []>} : vector<8x8xf32>, vector<8x128xf32>, vector<8x128xf32> -> vector<8x128xf32>
    %41 = arith.addf %36, %40 : vector<8x128xf32>
    %c126_i32 = arith.constant 126 : i32
    %42 = tpu.dynamic_rotate %1 by %c126_i32 dim 1 : vector<8x128xf32>, i32 -> vector<8x128xf32>
    %c8 = arith.constant 8 : index
    %c0_28 = arith.constant 0 : index
    %c0_29 = arith.constant 0 : index
    %43 = vector.load %arg2[%c8, %c0_28, %c0_29] : memref<13x8x8xf32, #tpu.memory_space<vmem>>, vector<1x8x8xf32>
    %44 = vector.shape_cast %43 : vector<1x8x8xf32> to vector<8x8xf32>
    %cst_30 = arith.constant dense<0.000000e+00> : vector<8x128xf32>
    %45 = tpu.matmul %44, %42, %cst_30 {dimension_numbers = #tpu.dot_dimension_numbers<[1], [0], [0], [1], [0, 0, 1, 1], [], []>} : vector<8x8xf32>, vector<8x128xf32>, vector<8x128xf32> -> vector<8x128xf32>
    %46 = arith.addf %41, %45 : vector<8x128xf32>
    %c125_i32 = arith.constant 125 : i32
    %47 = tpu.dynamic_rotate %1 by %c125_i32 dim 1 : vector<8x128xf32>, i32 -> vector<8x128xf32>
    %c9 = arith.constant 9 : index
    %c0_31 = arith.constant 0 : index
    %c0_32 = arith.constant 0 : index
    %48 = vector.load %arg2[%c9, %c0_31, %c0_32] : memref<13x8x8xf32, #tpu.memory_space<vmem>>, vector<1x8x8xf32>
    %49 = vector.shape_cast %48 : vector<1x8x8xf32> to vector<8x8xf32>
    %cst_33 = arith.constant dense<0.000000e+00> : vector<8x128xf32>
    %50 = tpu.matmul %49, %47, %cst_33 {dimension_numbers = #tpu.dot_dimension_numbers<[1], [0], [0], [1], [0, 0, 1, 1], [], []>} : vector<8x8xf32>, vector<8x128xf32>, vector<8x128xf32> -> vector<8x128xf32>
    %51 = arith.addf %46, %50 : vector<8x128xf32>
    %c124_i32 = arith.constant 124 : i32
    %52 = tpu.dynamic_rotate %1 by %c124_i32 dim 1 : vector<8x128xf32>, i32 -> vector<8x128xf32>
    %c10 = arith.constant 10 : index
    %c0_34 = arith.constant 0 : index
    %c0_35 = arith.constant 0 : index
    %53 = vector.load %arg2[%c10, %c0_34, %c0_35] : memref<13x8x8xf32, #tpu.memory_space<vmem>>, vector<1x8x8xf32>
    %54 = vector.shape_cast %53 : vector<1x8x8xf32> to vector<8x8xf32>
    %cst_36 = arith.constant dense<0.000000e+00> : vector<8x128xf32>
    %55 = tpu.matmul %54, %52, %cst_36 {dimension_numbers = #tpu.dot_dimension_numbers<[1], [0], [0], [1], [0, 0, 1, 1], [], []>} : vector<8x8xf32>, vector<8x128xf32>, vector<8x128xf32> -> vector<8x128xf32>
    %56 = arith.addf %51, %55 : vector<8x128xf32>
    %c123_i32 = arith.constant 123 : i32
    %57 = tpu.dynamic_rotate %1 by %c123_i32 dim 1 : vector<8x128xf32>, i32 -> vector<8x128xf32>
    %c11 = arith.constant 11 : index
    %c0_37 = arith.constant 0 : index
    %c0_38 = arith.constant 0 : index
    %58 = vector.load %arg2[%c11, %c0_37, %c0_38] : memref<13x8x8xf32, #tpu.memory_space<vmem>>, vector<1x8x8xf32>
    %59 = vector.shape_cast %58 : vector<1x8x8xf32> to vector<8x8xf32>
    %cst_39 = arith.constant dense<0.000000e+00> : vector<8x128xf32>
    %60 = tpu.matmul %59, %57, %cst_39 {dimension_numbers = #tpu.dot_dimension_numbers<[1], [0], [0], [1], [0, 0, 1, 1], [], []>} : vector<8x8xf32>, vector<8x128xf32>, vector<8x128xf32> -> vector<8x128xf32>
    %61 = arith.addf %56, %60 : vector<8x128xf32>
    %c122_i32 = arith.constant 122 : i32
    %62 = tpu.dynamic_rotate %1 by %c122_i32 dim 1 : vector<8x128xf32>, i32 -> vector<8x128xf32>
    %c12 = arith.constant 12 : index
    %c0_40 = arith.constant 0 : index
    %c0_41 = arith.constant 0 : index
    %63 = vector.load %arg2[%c12, %c0_40, %c0_41] : memref<13x8x8xf32, #tpu.memory_space<vmem>>, vector<1x8x8xf32>
    %64 = vector.shape_cast %63 : vector<1x8x8xf32> to vector<8x8xf32>
    %cst_42 = arith.constant dense<0.000000e+00> : vector<8x128xf32>
    %65 = tpu.matmul %64, %62, %cst_42 {dimension_numbers = #tpu.dot_dimension_numbers<[1], [0], [0], [1], [0, 0, 1, 1], [], []>} : vector<8x8xf32>, vector<8x128xf32>, vector<8x128xf32> -> vector<8x128xf32>
    %66 = arith.addf %61, %65 : vector<8x128xf32>
    %cst_43 = arith.constant 0.000000e+00 : f32
    %67 = vector.broadcast %cst_43 : f32 to vector<8x128xf32>
    %68 = arith.maximumf %66, %67 : vector<8x128xf32>
    %c0_44 = arith.constant 0 : index
    %c0_45 = arith.constant 0 : index
    %69 = vector.load %arg5[%c0_44, %c0_45] : memref<8x128xf32, #tpu.memory_space<vmem>>, vector<8x128xf32>
    %c6_i32_46 = arith.constant 6 : i32
    %70 = tpu.dynamic_rotate %68 by %c6_i32_46 dim 1 : vector<8x128xf32>, i32 -> vector<8x128xf32>
    %c0_47 = arith.constant 0 : index
    %c0_48 = arith.constant 0 : index
    %c0_49 = arith.constant 0 : index
    %71 = vector.load %arg4[%c0_47, %c0_48, %c0_49] : memref<13x8x8xf32, #tpu.memory_space<vmem>>, vector<1x8x8xf32>
    %72 = vector.shape_cast %71 : vector<1x8x8xf32> to vector<8x8xf32>
    %cst_50 = arith.constant dense<0.000000e+00> : vector<8x128xf32>
    %73 = tpu.matmul %72, %70, %cst_50 {dimension_numbers = #tpu.dot_dimension_numbers<[1], [0], [0], [1], [0, 0, 1, 1], [], []>} : vector<8x8xf32>, vector<8x128xf32>, vector<8x128xf32> -> vector<8x128xf32>
    %74 = arith.addf %69, %73 : vector<8x128xf32>
    %c5_i32_51 = arith.constant 5 : i32
    %75 = tpu.dynamic_rotate %68 by %c5_i32_51 dim 1 : vector<8x128xf32>, i32 -> vector<8x128xf32>
    %c1_52 = arith.constant 1 : index
    %c0_53 = arith.constant 0 : index
    %c0_54 = arith.constant 0 : index
    %76 = vector.load %arg4[%c1_52, %c0_53, %c0_54] : memref<13x8x8xf32, #tpu.memory_space<vmem>>, vector<1x8x8xf32>
    %77 = vector.shape_cast %76 : vector<1x8x8xf32> to vector<8x8xf32>
    %cst_55 = arith.constant dense<0.000000e+00> : vector<8x128xf32>
    %78 = tpu.matmul %77, %75, %cst_55 {dimension_numbers = #tpu.dot_dimension_numbers<[1], [0], [0], [1], [0, 0, 1, 1], [], []>} : vector<8x8xf32>, vector<8x128xf32>, vector<8x128xf32> -> vector<8x128xf32>
    %79 = arith.addf %74, %78 : vector<8x128xf32>
    %c4_i32_56 = arith.constant 4 : i32
    %80 = tpu.dynamic_rotate %68 by %c4_i32_56 dim 1 : vector<8x128xf32>, i32 -> vector<8x128xf32>
    %c2_57 = arith.constant 2 : index
    %c0_58 = arith.constant 0 : index
    %c0_59 = arith.constant 0 : index
    %81 = vector.load %arg4[%c2_57, %c0_58, %c0_59] : memref<13x8x8xf32, #tpu.memory_space<vmem>>, vector<1x8x8xf32>
    %82 = vector.shape_cast %81 : vector<1x8x8xf32> to vector<8x8xf32>
    %cst_60 = arith.constant dense<0.000000e+00> : vector<8x128xf32>
    %83 = tpu.matmul %82, %80, %cst_60 {dimension_numbers = #tpu.dot_dimension_numbers<[1], [0], [0], [1], [0, 0, 1, 1], [], []>} : vector<8x8xf32>, vector<8x128xf32>, vector<8x128xf32> -> vector<8x128xf32>
    %84 = arith.addf %79, %83 : vector<8x128xf32>
    %c3_i32_61 = arith.constant 3 : i32
    %85 = tpu.dynamic_rotate %68 by %c3_i32_61 dim 1 : vector<8x128xf32>, i32 -> vector<8x128xf32>
    %c3_62 = arith.constant 3 : index
    %c0_63 = arith.constant 0 : index
    %c0_64 = arith.constant 0 : index
    %86 = vector.load %arg4[%c3_62, %c0_63, %c0_64] : memref<13x8x8xf32, #tpu.memory_space<vmem>>, vector<1x8x8xf32>
    %87 = vector.shape_cast %86 : vector<1x8x8xf32> to vector<8x8xf32>
    %cst_65 = arith.constant dense<0.000000e+00> : vector<8x128xf32>
    %88 = tpu.matmul %87, %85, %cst_65 {dimension_numbers = #tpu.dot_dimension_numbers<[1], [0], [0], [1], [0, 0, 1, 1], [], []>} : vector<8x8xf32>, vector<8x128xf32>, vector<8x128xf32> -> vector<8x128xf32>
    %89 = arith.addf %84, %88 : vector<8x128xf32>
    %c2_i32_66 = arith.constant 2 : i32
    %90 = tpu.dynamic_rotate %68 by %c2_i32_66 dim 1 : vector<8x128xf32>, i32 -> vector<8x128xf32>
    %c4_67 = arith.constant 4 : index
    %c0_68 = arith.constant 0 : index
    %c0_69 = arith.constant 0 : index
    %91 = vector.load %arg4[%c4_67, %c0_68, %c0_69] : memref<13x8x8xf32, #tpu.memory_space<vmem>>, vector<1x8x8xf32>
    %92 = vector.shape_cast %91 : vector<1x8x8xf32> to vector<8x8xf32>
    %cst_70 = arith.constant dense<0.000000e+00> : vector<8x128xf32>
    %93 = tpu.matmul %92, %90, %cst_70 {dimension_numbers = #tpu.dot_dimension_numbers<[1], [0], [0], [1], [0, 0, 1, 1], [], []>} : vector<8x8xf32>, vector<8x128xf32>, vector<8x128xf32> -> vector<8x128xf32>
    %94 = arith.addf %89, %93 : vector<8x128xf32>
    %c1_i32_71 = arith.constant 1 : i32
    %95 = tpu.dynamic_rotate %68 by %c1_i32_71 dim 1 : vector<8x128xf32>, i32 -> vector<8x128xf32>
    %c5_72 = arith.constant 5 : index
    %c0_73 = arith.constant 0 : index
    %c0_74 = arith.constant 0 : index
    %96 = vector.load %arg4[%c5_72, %c0_73, %c0_74] : memref<13x8x8xf32, #tpu.memory_space<vmem>>, vector<1x8x8xf32>
    %97 = vector.shape_cast %96 : vector<1x8x8xf32> to vector<8x8xf32>
    %cst_75 = arith.constant dense<0.000000e+00> : vector<8x128xf32>
    %98 = tpu.matmul %97, %95, %cst_75 {dimension_numbers = #tpu.dot_dimension_numbers<[1], [0], [0], [1], [0, 0, 1, 1], [], []>} : vector<8x8xf32>, vector<8x128xf32>, vector<8x128xf32> -> vector<8x128xf32>
    %99 = arith.addf %94, %98 : vector<8x128xf32>
    %c6_76 = arith.constant 6 : index
    %c0_77 = arith.constant 0 : index
    %c0_78 = arith.constant 0 : index
    %100 = vector.load %arg4[%c6_76, %c0_77, %c0_78] : memref<13x8x8xf32, #tpu.memory_space<vmem>>, vector<1x8x8xf32>
    %101 = vector.shape_cast %100 : vector<1x8x8xf32> to vector<8x8xf32>
    %cst_79 = arith.constant dense<0.000000e+00> : vector<8x128xf32>
    %102 = tpu.matmul %101, %68, %cst_79 {dimension_numbers = #tpu.dot_dimension_numbers<[1], [0], [0], [1], [0, 0, 1, 1], [], []>} : vector<8x8xf32>, vector<8x128xf32>, vector<8x128xf32> -> vector<8x128xf32>
    %103 = arith.addf %99, %102 : vector<8x128xf32>
    %c127_i32_80 = arith.constant 127 : i32
    %104 = tpu.dynamic_rotate %68 by %c127_i32_80 dim 1 : vector<8x128xf32>, i32 -> vector<8x128xf32>
    %c7_81 = arith.constant 7 : index
    %c0_82 = arith.constant 0 : index
    %c0_83 = arith.constant 0 : index
    %105 = vector.load %arg4[%c7_81, %c0_82, %c0_83] : memref<13x8x8xf32, #tpu.memory_space<vmem>>, vector<1x8x8xf32>
    %106 = vector.shape_cast %105 : vector<1x8x8xf32> to vector<8x8xf32>
    %cst_84 = arith.constant dense<0.000000e+00> : vector<8x128xf32>
    %107 = tpu.matmul %106, %104, %cst_84 {dimension_numbers = #tpu.dot_dimension_numbers<[1], [0], [0], [1], [0, 0, 1, 1], [], []>} : vector<8x8xf32>, vector<8x128xf32>, vector<8x128xf32> -> vector<8x128xf32>
    %108 = arith.addf %103, %107 : vector<8x128xf32>
    %c126_i32_85 = arith.constant 126 : i32
    %109 = tpu.dynamic_rotate %68 by %c126_i32_85 dim 1 : vector<8x128xf32>, i32 -> vector<8x128xf32>
    %c8_86 = arith.constant 8 : index
    %c0_87 = arith.constant 0 : index
    %c0_88 = arith.constant 0 : index
    %110 = vector.load %arg4[%c8_86, %c0_87, %c0_88] : memref<13x8x8xf32, #tpu.memory_space<vmem>>, vector<1x8x8xf32>
    %111 = vector.shape_cast %110 : vector<1x8x8xf32> to vector<8x8xf32>
    %cst_89 = arith.constant dense<0.000000e+00> : vector<8x128xf32>
    %112 = tpu.matmul %111, %109, %cst_89 {dimension_numbers = #tpu.dot_dimension_numbers<[1], [0], [0], [1], [0, 0, 1, 1], [], []>} : vector<8x8xf32>, vector<8x128xf32>, vector<8x128xf32> -> vector<8x128xf32>
    %113 = arith.addf %108, %112 : vector<8x128xf32>
    %c125_i32_90 = arith.constant 125 : i32
    %114 = tpu.dynamic_rotate %68 by %c125_i32_90 dim 1 : vector<8x128xf32>, i32 -> vector<8x128xf32>
    %c9_91 = arith.constant 9 : index
    %c0_92 = arith.constant 0 : index
    %c0_93 = arith.constant 0 : index
    %115 = vector.load %arg4[%c9_91, %c0_92, %c0_93] : memref<13x8x8xf32, #tpu.memory_space<vmem>>, vector<1x8x8xf32>
    %116 = vector.shape_cast %115 : vector<1x8x8xf32> to vector<8x8xf32>
    %cst_94 = arith.constant dense<0.000000e+00> : vector<8x128xf32>
    %117 = tpu.matmul %116, %114, %cst_94 {dimension_numbers = #tpu.dot_dimension_numbers<[1], [0], [0], [1], [0, 0, 1, 1], [], []>} : vector<8x8xf32>, vector<8x128xf32>, vector<8x128xf32> -> vector<8x128xf32>
    %118 = arith.addf %113, %117 : vector<8x128xf32>
    %c124_i32_95 = arith.constant 124 : i32
    %119 = tpu.dynamic_rotate %68 by %c124_i32_95 dim 1 : vector<8x128xf32>, i32 -> vector<8x128xf32>
    %c10_96 = arith.constant 10 : index
    %c0_97 = arith.constant 0 : index
    %c0_98 = arith.constant 0 : index
    %120 = vector.load %arg4[%c10_96, %c0_97, %c0_98] : memref<13x8x8xf32, #tpu.memory_space<vmem>>, vector<1x8x8xf32>
    %121 = vector.shape_cast %120 : vector<1x8x8xf32> to vector<8x8xf32>
    %cst_99 = arith.constant dense<0.000000e+00> : vector<8x128xf32>
    %122 = tpu.matmul %121, %119, %cst_99 {dimension_numbers = #tpu.dot_dimension_numbers<[1], [0], [0], [1], [0, 0, 1, 1], [], []>} : vector<8x8xf32>, vector<8x128xf32>, vector<8x128xf32> -> vector<8x128xf32>
    %123 = arith.addf %118, %122 : vector<8x128xf32>
    %c123_i32_100 = arith.constant 123 : i32
    %124 = tpu.dynamic_rotate %68 by %c123_i32_100 dim 1 : vector<8x128xf32>, i32 -> vector<8x128xf32>
    %c11_101 = arith.constant 11 : index
    %c0_102 = arith.constant 0 : index
    %c0_103 = arith.constant 0 : index
    %125 = vector.load %arg4[%c11_101, %c0_102, %c0_103] : memref<13x8x8xf32, #tpu.memory_space<vmem>>, vector<1x8x8xf32>
    %126 = vector.shape_cast %125 : vector<1x8x8xf32> to vector<8x8xf32>
    %cst_104 = arith.constant dense<0.000000e+00> : vector<8x128xf32>
    %127 = tpu.matmul %126, %124, %cst_104 {dimension_numbers = #tpu.dot_dimension_numbers<[1], [0], [0], [1], [0, 0, 1, 1], [], []>} : vector<8x8xf32>, vector<8x128xf32>, vector<8x128xf32> -> vector<8x128xf32>
    %128 = arith.addf %123, %127 : vector<8x128xf32>
    %c122_i32_105 = arith.constant 122 : i32
    %129 = tpu.dynamic_rotate %68 by %c122_i32_105 dim 1 : vector<8x128xf32>, i32 -> vector<8x128xf32>
    %c12_106 = arith.constant 12 : index
    %c0_107 = arith.constant 0 : index
    %c0_108 = arith.constant 0 : index
    %130 = vector.load %arg4[%c12_106, %c0_107, %c0_108] : memref<13x8x8xf32, #tpu.memory_space<vmem>>, vector<1x8x8xf32>
    %131 = vector.shape_cast %130 : vector<1x8x8xf32> to vector<8x8xf32>
    %cst_109 = arith.constant dense<0.000000e+00> : vector<8x128xf32>
    %132 = tpu.matmul %131, %129, %cst_109 {dimension_numbers = #tpu.dot_dimension_numbers<[1], [0], [0], [1], [0, 0, 1, 1], [], []>} : vector<8x8xf32>, vector<8x128xf32>, vector<8x128xf32> -> vector<8x128xf32>
    %133 = arith.addf %128, %132 : vector<8x128xf32>
    %cst_110 = arith.constant 0.000000e+00 : f32
    %134 = vector.broadcast %cst_110 : f32 to vector<8x128xf32>
    %135 = arith.maximumf %133, %134 : vector<8x128xf32>
    %c0_111 = arith.constant 0 : index
    %c0_112 = arith.constant 0 : index
    %136 = vector.load %arg7[%c0_111, %c0_112] : memref<8x128xf32, #tpu.memory_space<vmem>>, vector<8x128xf32>
    %c6_i32_113 = arith.constant 6 : i32
    %137 = tpu.dynamic_rotate %135 by %c6_i32_113 dim 1 : vector<8x128xf32>, i32 -> vector<8x128xf32>
    %c0_114 = arith.constant 0 : index
    %c0_115 = arith.constant 0 : index
    %c0_116 = arith.constant 0 : index
    %138 = vector.load %arg6[%c0_114, %c0_115, %c0_116] : memref<13x8x8xf32, #tpu.memory_space<vmem>>, vector<1x8x8xf32>
    %139 = vector.shape_cast %138 : vector<1x8x8xf32> to vector<8x8xf32>
    %cst_117 = arith.constant dense<0.000000e+00> : vector<8x128xf32>
    %140 = tpu.matmul %139, %137, %cst_117 {dimension_numbers = #tpu.dot_dimension_numbers<[1], [0], [0], [1], [0, 0, 1, 1], [], []>} : vector<8x8xf32>, vector<8x128xf32>, vector<8x128xf32> -> vector<8x128xf32>
    %141 = arith.addf %136, %140 : vector<8x128xf32>
    %c5_i32_118 = arith.constant 5 : i32
    %142 = tpu.dynamic_rotate %135 by %c5_i32_118 dim 1 : vector<8x128xf32>, i32 -> vector<8x128xf32>
    %c1_119 = arith.constant 1 : index
    %c0_120 = arith.constant 0 : index
    %c0_121 = arith.constant 0 : index
    %143 = vector.load %arg6[%c1_119, %c0_120, %c0_121] : memref<13x8x8xf32, #tpu.memory_space<vmem>>, vector<1x8x8xf32>
    %144 = vector.shape_cast %143 : vector<1x8x8xf32> to vector<8x8xf32>
    %cst_122 = arith.constant dense<0.000000e+00> : vector<8x128xf32>
    %145 = tpu.matmul %144, %142, %cst_122 {dimension_numbers = #tpu.dot_dimension_numbers<[1], [0], [0], [1], [0, 0, 1, 1], [], []>} : vector<8x8xf32>, vector<8x128xf32>, vector<8x128xf32> -> vector<8x128xf32>
    %146 = arith.addf %141, %145 : vector<8x128xf32>
    %c4_i32_123 = arith.constant 4 : i32
    %147 = tpu.dynamic_rotate %135 by %c4_i32_123 dim 1 : vector<8x128xf32>, i32 -> vector<8x128xf32>
    %c2_124 = arith.constant 2 : index
    %c0_125 = arith.constant 0 : index
    %c0_126 = arith.constant 0 : index
    %148 = vector.load %arg6[%c2_124, %c0_125, %c0_126] : memref<13x8x8xf32, #tpu.memory_space<vmem>>, vector<1x8x8xf32>
    %149 = vector.shape_cast %148 : vector<1x8x8xf32> to vector<8x8xf32>
    %cst_127 = arith.constant dense<0.000000e+00> : vector<8x128xf32>
    %150 = tpu.matmul %149, %147, %cst_127 {dimension_numbers = #tpu.dot_dimension_numbers<[1], [0], [0], [1], [0, 0, 1, 1], [], []>} : vector<8x8xf32>, vector<8x128xf32>, vector<8x128xf32> -> vector<8x128xf32>
    %151 = arith.addf %146, %150 : vector<8x128xf32>
    %c3_i32_128 = arith.constant 3 : i32
    %152 = tpu.dynamic_rotate %135 by %c3_i32_128 dim 1 : vector<8x128xf32>, i32 -> vector<8x128xf32>
    %c3_129 = arith.constant 3 : index
    %c0_130 = arith.constant 0 : index
    %c0_131 = arith.constant 0 : index
    %153 = vector.load %arg6[%c3_129, %c0_130, %c0_131] : memref<13x8x8xf32, #tpu.memory_space<vmem>>, vector<1x8x8xf32>
    %154 = vector.shape_cast %153 : vector<1x8x8xf32> to vector<8x8xf32>
    %cst_132 = arith.constant dense<0.000000e+00> : vector<8x128xf32>
    %155 = tpu.matmul %154, %152, %cst_132 {dimension_numbers = #tpu.dot_dimension_numbers<[1], [0], [0], [1], [0, 0, 1, 1], [], []>} : vector<8x8xf32>, vector<8x128xf32>, vector<8x128xf32> -> vector<8x128xf32>
    %156 = arith.addf %151, %155 : vector<8x128xf32>
    %c2_i32_133 = arith.constant 2 : i32
    %157 = tpu.dynamic_rotate %135 by %c2_i32_133 dim 1 : vector<8x128xf32>, i32 -> vector<8x128xf32>
    %c4_134 = arith.constant 4 : index
    %c0_135 = arith.constant 0 : index
    %c0_136 = arith.constant 0 : index
    %158 = vector.load %arg6[%c4_134, %c0_135, %c0_136] : memref<13x8x8xf32, #tpu.memory_space<vmem>>, vector<1x8x8xf32>
    %159 = vector.shape_cast %158 : vector<1x8x8xf32> to vector<8x8xf32>
    %cst_137 = arith.constant dense<0.000000e+00> : vector<8x128xf32>
    %160 = tpu.matmul %159, %157, %cst_137 {dimension_numbers = #tpu.dot_dimension_numbers<[1], [0], [0], [1], [0, 0, 1, 1], [], []>} : vector<8x8xf32>, vector<8x128xf32>, vector<8x128xf32> -> vector<8x128xf32>
    %161 = arith.addf %156, %160 : vector<8x128xf32>
    %c1_i32_138 = arith.constant 1 : i32
    %162 = tpu.dynamic_rotate %135 by %c1_i32_138 dim 1 : vector<8x128xf32>, i32 -> vector<8x128xf32>
    %c5_139 = arith.constant 5 : index
    %c0_140 = arith.constant 0 : index
    %c0_141 = arith.constant 0 : index
    %163 = vector.load %arg6[%c5_139, %c0_140, %c0_141] : memref<13x8x8xf32, #tpu.memory_space<vmem>>, vector<1x8x8xf32>
    %164 = vector.shape_cast %163 : vector<1x8x8xf32> to vector<8x8xf32>
    %cst_142 = arith.constant dense<0.000000e+00> : vector<8x128xf32>
    %165 = tpu.matmul %164, %162, %cst_142 {dimension_numbers = #tpu.dot_dimension_numbers<[1], [0], [0], [1], [0, 0, 1, 1], [], []>} : vector<8x8xf32>, vector<8x128xf32>, vector<8x128xf32> -> vector<8x128xf32>
    %166 = arith.addf %161, %165 : vector<8x128xf32>
    %c6_143 = arith.constant 6 : index
    %c0_144 = arith.constant 0 : index
    %c0_145 = arith.constant 0 : index
    %167 = vector.load %arg6[%c6_143, %c0_144, %c0_145] : memref<13x8x8xf32, #tpu.memory_space<vmem>>, vector<1x8x8xf32>
    %168 = vector.shape_cast %167 : vector<1x8x8xf32> to vector<8x8xf32>
    %cst_146 = arith.constant dense<0.000000e+00> : vector<8x128xf32>
    %169 = tpu.matmul %168, %135, %cst_146 {dimension_numbers = #tpu.dot_dimension_numbers<[1], [0], [0], [1], [0, 0, 1, 1], [], []>} : vector<8x8xf32>, vector<8x128xf32>, vector<8x128xf32> -> vector<8x128xf32>
    %170 = arith.addf %166, %169 : vector<8x128xf32>
    %c127_i32_147 = arith.constant 127 : i32
    %171 = tpu.dynamic_rotate %135 by %c127_i32_147 dim 1 : vector<8x128xf32>, i32 -> vector<8x128xf32>
    %c7_148 = arith.constant 7 : index
    %c0_149 = arith.constant 0 : index
    %c0_150 = arith.constant 0 : index
    %172 = vector.load %arg6[%c7_148, %c0_149, %c0_150] : memref<13x8x8xf32, #tpu.memory_space<vmem>>, vector<1x8x8xf32>
    %173 = vector.shape_cast %172 : vector<1x8x8xf32> to vector<8x8xf32>
    %cst_151 = arith.constant dense<0.000000e+00> : vector<8x128xf32>
    %174 = tpu.matmul %173, %171, %cst_151 {dimension_numbers = #tpu.dot_dimension_numbers<[1], [0], [0], [1], [0, 0, 1, 1], [], []>} : vector<8x8xf32>, vector<8x128xf32>, vector<8x128xf32> -> vector<8x128xf32>
    %175 = arith.addf %170, %174 : vector<8x128xf32>
    %c126_i32_152 = arith.constant 126 : i32
    %176 = tpu.dynamic_rotate %135 by %c126_i32_152 dim 1 : vector<8x128xf32>, i32 -> vector<8x128xf32>
    %c8_153 = arith.constant 8 : index
    %c0_154 = arith.constant 0 : index
    %c0_155 = arith.constant 0 : index
    %177 = vector.load %arg6[%c8_153, %c0_154, %c0_155] : memref<13x8x8xf32, #tpu.memory_space<vmem>>, vector<1x8x8xf32>
    %178 = vector.shape_cast %177 : vector<1x8x8xf32> to vector<8x8xf32>
    %cst_156 = arith.constant dense<0.000000e+00> : vector<8x128xf32>
    %179 = tpu.matmul %178, %176, %cst_156 {dimension_numbers = #tpu.dot_dimension_numbers<[1], [0], [0], [1], [0, 0, 1, 1], [], []>} : vector<8x8xf32>, vector<8x128xf32>, vector<8x128xf32> -> vector<8x128xf32>
    %180 = arith.addf %175, %179 : vector<8x128xf32>
    %c125_i32_157 = arith.constant 125 : i32
    %181 = tpu.dynamic_rotate %135 by %c125_i32_157 dim 1 : vector<8x128xf32>, i32 -> vector<8x128xf32>
    %c9_158 = arith.constant 9 : index
    %c0_159 = arith.constant 0 : index
    %c0_160 = arith.constant 0 : index
    %182 = vector.load %arg6[%c9_158, %c0_159, %c0_160] : memref<13x8x8xf32, #tpu.memory_space<vmem>>, vector<1x8x8xf32>
    %183 = vector.shape_cast %182 : vector<1x8x8xf32> to vector<8x8xf32>
    %cst_161 = arith.constant dense<0.000000e+00> : vector<8x128xf32>
    %184 = tpu.matmul %183, %181, %cst_161 {dimension_numbers = #tpu.dot_dimension_numbers<[1], [0], [0], [1], [0, 0, 1, 1], [], []>} : vector<8x8xf32>, vector<8x128xf32>, vector<8x128xf32> -> vector<8x128xf32>
    %185 = arith.addf %180, %184 : vector<8x128xf32>
    %c124_i32_162 = arith.constant 124 : i32
    %186 = tpu.dynamic_rotate %135 by %c124_i32_162 dim 1 : vector<8x128xf32>, i32 -> vector<8x128xf32>
    %c10_163 = arith.constant 10 : index
    %c0_164 = arith.constant 0 : index
    %c0_165 = arith.constant 0 : index
    %187 = vector.load %arg6[%c10_163, %c0_164, %c0_165] : memref<13x8x8xf32, #tpu.memory_space<vmem>>, vector<1x8x8xf32>
    %188 = vector.shape_cast %187 : vector<1x8x8xf32> to vector<8x8xf32>
    %cst_166 = arith.constant dense<0.000000e+00> : vector<8x128xf32>
    %189 = tpu.matmul %188, %186, %cst_166 {dimension_numbers = #tpu.dot_dimension_numbers<[1], [0], [0], [1], [0, 0, 1, 1], [], []>} : vector<8x8xf32>, vector<8x128xf32>, vector<8x128xf32> -> vector<8x128xf32>
    %190 = arith.addf %185, %189 : vector<8x128xf32>
    %c123_i32_167 = arith.constant 123 : i32
    %191 = tpu.dynamic_rotate %135 by %c123_i32_167 dim 1 : vector<8x128xf32>, i32 -> vector<8x128xf32>
    %c11_168 = arith.constant 11 : index
    %c0_169 = arith.constant 0 : index
    %c0_170 = arith.constant 0 : index
    %192 = vector.load %arg6[%c11_168, %c0_169, %c0_170] : memref<13x8x8xf32, #tpu.memory_space<vmem>>, vector<1x8x8xf32>
    %193 = vector.shape_cast %192 : vector<1x8x8xf32> to vector<8x8xf32>
    %cst_171 = arith.constant dense<0.000000e+00> : vector<8x128xf32>
    %194 = tpu.matmul %193, %191, %cst_171 {dimension_numbers = #tpu.dot_dimension_numbers<[1], [0], [0], [1], [0, 0, 1, 1], [], []>} : vector<8x8xf32>, vector<8x128xf32>, vector<8x128xf32> -> vector<8x128xf32>
    %195 = arith.addf %190, %194 : vector<8x128xf32>
    %c122_i32_172 = arith.constant 122 : i32
    %196 = tpu.dynamic_rotate %135 by %c122_i32_172 dim 1 : vector<8x128xf32>, i32 -> vector<8x128xf32>
    %c12_173 = arith.constant 12 : index
    %c0_174 = arith.constant 0 : index
    %c0_175 = arith.constant 0 : index
    %197 = vector.load %arg6[%c12_173, %c0_174, %c0_175] : memref<13x8x8xf32, #tpu.memory_space<vmem>>, vector<1x8x8xf32>
    %198 = vector.shape_cast %197 : vector<1x8x8xf32> to vector<8x8xf32>
    %cst_176 = arith.constant dense<0.000000e+00> : vector<8x128xf32>
    %199 = tpu.matmul %198, %196, %cst_176 {dimension_numbers = #tpu.dot_dimension_numbers<[1], [0], [0], [1], [0, 0, 1, 1], [], []>} : vector<8x8xf32>, vector<8x128xf32>, vector<8x128xf32> -> vector<8x128xf32>
    %200 = arith.addf %195, %199 : vector<8x128xf32>
    %c0_177 = arith.constant 0 : index
    %c0_178 = arith.constant 0 : index
    %c0_179 = arith.constant 0 : index
    %201 = vector.load %arg8[%c0_177, %c0_178, %c0_179] : memref<1x8x128xf32, #tpu.memory_space<vmem>>, vector<1x8x128xf32>
    %202 = vector.shape_cast %201 : vector<1x8x128xf32> to vector<8x128xf32>
    %203 = vector.shape_cast %200 : vector<8x128xf32> to vector<1x8x128xf32>
    tpu.vector_store %arg8[%c0_177, %c0_178, %c0_179], %203 {strides = array<i32>} : memref<1x8x128xf32, #tpu.memory_space<vmem>>, vector<1x8x128xf32>,
    return
  }
  func.func @transform_0(%arg0: i32) -> (i32, i32, i32) {
    %c0_i32 = arith.constant 0 : i32
    %c0_i32_0 = arith.constant 0 : i32
    %c0_i32_1 = arith.constant 0 : i32
    return %arg0, %c0_i32, %c0_i32_0 : i32, i32, i32
  }
  func.func @transform_1(%arg0: i32) -> (i32, i32, i32) {
    %c0_i32 = arith.constant 0 : i32
    %c0_i32_0 = arith.constant 0 : i32
    %c0_i32_1 = arith.constant 0 : i32
    %c0_i32_2 = arith.constant 0 : i32
    return %c0_i32, %c0_i32_0, %c0_i32_1 : i32, i32, i32
  }
  func.func @transform_2(%arg0: i32) -> (i32, i32) {
    %c0_i32 = arith.constant 0 : i32
    %c0_i32_0 = arith.constant 0 : i32
    %c0_i32_1 = arith.constant 0 : i32
    return %c0_i32, %c0_i32_0 : i32, i32
  }
  func.func @transform_3(%arg0: i32) -> (i32, i32, i32) {
    %c0_i32 = arith.constant 0 : i32
    %c0_i32_0 = arith.constant 0 : i32
    %c0_i32_1 = arith.constant 0 : i32
    %c0_i32_2 = arith.constant 0 : i32
    return %c0_i32, %c0_i32_0, %c0_i32_1 : i32, i32, i32
  }
  func.func @transform_4(%arg0: i32) -> (i32, i32) {
    %c0_i32 = arith.constant 0 : i32
    %c0_i32_0 = arith.constant 0 : i32
    %c0_i32_1 = arith.constant 0 : i32
    return %c0_i32, %c0_i32_0 : i32, i32
  }
  func.func @transform_5(%arg0: i32) -> (i32, i32, i32) {
    %c0_i32 = arith.constant 0 : i32
    %c0_i32_0 = arith.constant 0 : i32
    %c0_i32_1 = arith.constant 0 : i32
    %c0_i32_2 = arith.constant 0 : i32
    return %c0_i32, %c0_i32_0, %c0_i32_1 : i32, i32, i32
  }
  func.func @transform_6(%arg0: i32) -> (i32, i32) {
    %c0_i32 = arith.constant 0 : i32
    %c0_i32_0 = arith.constant 0 : i32
    %c0_i32_1 = arith.constant 0 : i32
    return %c0_i32, %c0_i32_0 : i32, i32
  }
  func.func @transform_7(%arg0: i32) -> (i32, i32, i32) {
    %c0_i32 = arith.constant 0 : i32
    %c0_i32_0 = arith.constant 0 : i32
    %c0_i32_1 = arith.constant 0 : i32
    return %arg0, %c0_i32, %c0_i32_0 : i32, i32, i32
  }
}

</mosaic_0001>

<bundles_post_ra>
// kernel: tpu_custom_call.1
= control target key start
LH: loop header
LB: loop body
LE: loop exit
PB: predicated region body
PF: predicated region fallthrough
CT: control target
= control target key end

     0   :  { %12 = vsyncpa [#allocation3], 0  ;;  %s1978_s0 = inlined_call_operand.vmem [shape: f32[2,8,128], index: 0, kind: input, shape index: {}]   ;;  %s1979_s1 = inlined_call_operand.vmem [shape: f32[13,8,8], index: 1, kind: input, shape index: {}]   ;;  %s1980_s2 = inlined_call_operand.vmem [shape: f32[8,128], index: 2, kind: input, shape index: {}]   ;;  %s1981_s3 = inlined_call_operand.vmem [shape: f32[13,8,8], index: 3, kind: input, shape index: {}]   ;;  %s1982_s4 = inlined_call_operand.vmem [shape: f32[8,128], index: 4, kind: input, shape index: {}]   ;;  %s1983_s5 = inlined_call_operand.vmem [shape: f32[13,8,8], index: 5, kind: input, shape index: {}]   ;;  %s1984_s6 = inlined_call_operand.vmem [shape: f32[8,128], index: 6, kind: input, shape index: {}]   ;;  %s1985_s7 = inlined_call_operand.hbm [shape: f32[2,8,128], index: 7, kind: output, shape index: {}]  }
   0x1   :  { %14 = vsyncpa [#allocation3 + $0x1], 0  ;;  %s1692_s24 = smov 0   ;;  %s1694_s25 = smov 0  }
   0x2   :  { %s1696_s26 = smov 0   ;;  %s1698_s27 = smov 0  }
   0x3 LB: > { %s1713_s28 = sadd.s32 4294967295, %s1638_s27   ;;  %s1440_s29 = sadd.s32 4294967294, %s1638_s27   ;;  %s1638_s27 = sphi %s1698_s27, %s2021_s27   ;;  %s1634_s26 = sphi %s1696_s26, %s2020_s26   ;;  %s1630_s25 = sphi %s1694_s25, %s2019_s25   ;;  %s1626_s24 = sphi %s1692_s24, %s2018_s24  }
   0x4   : > { %s1717_s30 = sadd.s32 1, %s1638_s27   ;;  %s179_s8 = sadd.s32 1, %s1634_s26 }
   0x5   : > { %s176_s9 = ssub.s32 %s1638_s27, %s1717_s30  ;;  %p189_p0 = scmp.ne.s32.totalorder %s1634_s26, %s1630_s25 }
   0x6   : > { %p177_p1 = scmp.eq.s32.totalorder %s176_s9, 0  ;;  %p190_p2 = scmp.eq.s32.totalorder %s1713_s28, 1 }
   0x7   : > { %p195_p3 = scmp.ne.s32.totalorder %s1630_s25, %s1626_s24  ;;  %p196_p4 = scmp.eq.s32.totalorder %s1440_s29, 1 }
   0x8   : > { %s1728_s10 = scalar_select %p177_p1, %s1634_s26, %s179_s8  }
   0x9   : > { %p1730_p5 = por %p190_p2, %p189_p0  ;;  %p1734_p6 = por %p196_p4, %p195_p3 }
   0xa   : > { %p1443_p7 = scmp.ge.s32.totalorder %s1638_s27, 1  ;;  %p239_p8 = scmp.lt.s32.totalorder %s1638_s27, 3 }
   0xc   : > { %p240_p9 = pnand %p1443_p7, %p239_p8 }
   0xd   : > { %p270_p10 = scmp.lt.s32.totalorder (!%p240_p9), %s1713_s28, 1  ;;  %s1998_s18 = smov (!%p240_p9), 4  }
   0xe   : > { %243 = sbr.rel (%p240_p9) target bundleno = 859 (0x35b), region = 48  ;;  %s2000_s19 = smov (!%p240_p9), 3  }
   0xf   : > { %s2003_s20 = smov (!%p240_p9), 2   ;;  %s2001_s21 = smov (!%p240_p9), 6  }
  0x10   : > { %s2002_s22 = smov (!%p240_p9), 5   ;;  %s1986_s23 = smov (!%p240_p9), 127  }
  0x11   : > { %s1999_s29 = smov (!%p240_p9), 1   ;;  %s1988_s8 = smov (!%p240_p9), 124  }
  0x12   : > { %s1990_s9 = smov (!%p240_p9), 126   ;;  %s1994_s15 = smov (!%p240_p9), 122  }
  0x13   : > { %s271_s13 = scalar_select %p270_p10, %s1713_s28, 1  ;;  %vm279_vm0 = vcmask 64512   ;;  %v1449_v3 = vld [vmem:[%s1979_s1 + $0x10] sm:$0xff]  ;;  %v1451_v4 = vld [vmem:[%s1979_s1 + $0x18] sm:$0xff]  ;;  %v278_v8 = vld [vmem:[%s1979_s1] sm:$0xff] }
  0x14   : > { %v1447_v9 = vld [vmem:[%s1979_s1 + $0x8] sm:$0xff]  ;;  %v1457_v12 = vld [vmem:[%s1979_s1 + $0x30] sm:$0xff]  ;;  %v1459_v13 = vld [vmem:[%s1979_s1 + $0x38] sm:$0xff]  ;;  %s2008_s16 = smov 125  }
  0x15   : > { %s1445_s14 = sshll.u32 %s271_s13, 3  ;;  %s1992_s13 = smov 123   ;;  %v1453_v14 = vld [vmem:[%s1979_s1 + $0x20] sm:$0xff]  ;;  %v1455_v15 = vld [vmem:[%s1979_s1 + $0x28] sm:$0xff]  ;;  %v1465_v19 = vld [vmem:[%s1979_s1 + $0x50] sm:$0xff] }
  0x16   : > { %s273_s17 = scalar_lea.vmem %s1978_s0, %s1445_s14  ;;  %s1996_s14 = smov 125   ;;  %v1461_v20 = vld [vmem:[%s1979_s1 + $0x40] sm:$0xff]  ;;  %v1467_v21 = vld [vmem:[%s1979_s1 + $0x58] sm:$0xff]  ;;  %v1463_v24 = vld [vmem:[%s1979_s1 + $0x48] sm:$0xff] }
  0x17   : > { %v274_v0 = vld [vmem:[%s273_s17] sm:$0xff]  ;;  %s2009_s17 = smov 122   ;;  %v1474_v59 = vld [vmem:[%s1981_s3 + $0x10] sm:$0xff]  ;;  %v1472_v60 = vld [vmem:[%s1981_s3 + $0x8] sm:$0xff] }
  0x18   : > { %332 = vrot.lane.b32.xlu0 %v274_v0, %s1998_s18  ;;  %360 = vrot.lane.b32.xlu1 %v274_v0, %s2000_s19  ;;  %v1469_v25 = vld [vmem:[%s1979_s1 + $0x60] sm:$0xff]  ;;  %v1476_v63 = vld [vmem:[%s1981_s3 + $0x18] sm:$0xff] }
  0x19   : > { %388 = vrot.lane.b32.xlu2 %v274_v0, %s2003_s20  ;;  %v275_v26 = vld [vmem:[%s1980_s2] sm:$0xff] }
  0x1a   : > { %v642_v55 = vld [vmem:[%s1981_s3] sm:$0xff] }
  0x1b   : > { %v1478_v57 = vld [vmem:[%s1981_s3 + $0x20] sm:$0xff] }
  0x20   : > { %276 = vrot.lane.b32.xlu0 %v274_v0, %s2001_s21  ;;  %304 = vrot.lane.b32.xlu1 %v274_v0, %s2002_s22 }
  0x21   : > { %470 = vrot.lane.b32.xlu2 %v274_v0, %s1986_s23  ;;  %s2014_s23 = smov 6  }
  0x28   : > { %416 = vrot.lane.b32.xlu0 %v274_v0, %s1999_s29  ;;  %554 = vrot.lane.b32.xlu1 %v274_v0, %s1988_s8  ;;  %s2015_s8 = smov 3  }
  0x29   : > { %498 = vrot.lane.b32.xlu2 %v274_v0, %s1990_s9  ;;  %s2006_s9 = smov 124  }
  0x30   : > { %582 = vrot.lane.b32.xlu0 %v274_v0, %s1992_s13  ;;  %526 = vrot.lane.b32.xlu1 %v274_v0, %s1996_s14  ;;  %s2007_s13 = smov 127   ;;  %s2010_s14 = smov 123  }
  0x31   : > { %610 = vrot.lane.b32.xlu2 %v274_v0, %s1994_s15  ;;  %s2011_s15 = smov 126  }
  0x73   : > { %v389_v1 = vpop.permute.xlu2 %388 }
  0x7b   : > { %v471_v2 = vpop.permute.xlu2 %470 }
  0x83   : > { %v499_v7 = vpop.permute.xlu2 %498 }
  0x8a   : > { %v333_v5 = vpop.permute.xlu0 %332  ;;  %v361_v6 = vpop.permute.xlu1 %360 }
  0x8b   : > { %354 = vmatpush.msra.mxu2 %v333_v5  ;;  %382 = vmatpush.msra.mxu3 %v361_v6  ;;  %v611_v16 = vpop.permute.xlu2 %610  ;;  %v1488_v6 = vld [vmem:[%s1981_s3 + $0x48] sm:$0xff] }
  0x8c   : > { %1450 = vmatmul.msk.f32.vlgmr.msra.gmra.mxu2 %vm279_vm0, %v1449_v3  ;;  %1452 = vmatmul.msk.f32.vlgmr.msra.gmra.mxu3 %vm279_vm0, %v1451_v4  ;;  %v1484_v4 = vld [vmem:[%s1981_s3 + $0x38] sm:$0xff] }
  0x8d   : > { %464 = vmatpush.msrb.mxu2 %v274_v0  ;;  %492 = vmatpush.msrb.mxu3 %v471_v2  ;;  %v1482_v2 = vld [vmem:[%s1981_s3 + $0x30] sm:$0xff] }
  0x92   : > { %v277_v10 = vpop.permute.xlu0 %276  ;;  %v305_v11 = vpop.permute.xlu1 %304 }
  0x93   : > { %298 = vmatpush.msra.mxu0 %v277_v10  ;;  %326 = vmatpush.msra.mxu1 %v305_v11  ;;  %v1486_v11 = vld [vmem:[%s1981_s3 + $0x40] sm:$0xff] }
  0x94   : > { %1446 = vmatmul.msk.f32.vlgmr.msra.gmra.mxu0 %vm279_vm0, %v278_v8  ;;  %1448 = vmatmul.msk.f32.vlgmr.msra.gmra.mxu1 %vm279_vm0, %v1447_v9  ;;  %v1492_v9 = vld [vmem:[%s1981_s3 + $0x58] sm:$0xff] }
  0x95   : > { %410 = vmatpush.msrb.mxu0 %v389_v1  ;;  %1458 = vmatmul.msk.f32.vlgmr.msrb.gmra.mxu2 %vm279_vm0, %v1457_v12  ;;  %v1480_v1 = vld [vmem:[%s1981_s3 + $0x28] sm:$0xff] }
  0x96   : > { %1460 = vmatmul.msk.f32.vlgmr.msrb.gmra.mxu3 %vm279_vm0, %v1459_v13 }
  0x97   : > { %520 = vmatpush.msra.mxu0 %v499_v7  ;;  %v1490_v7 = vld [vmem:[%s1981_s3 + $0x50] sm:$0xff] }
  0x9a   : > { %v417_v17 = vpop.permute.xlu0 %416  ;;  %v555_v18 = vpop.permute.xlu1 %554 }
  0x9b   : > { %438 = vmatpush.msrb.mxu1 %v417_v17  ;;  %576 = vmatpush.msra.mxu2 %v555_v18 }
  0x9c   : > { %1454 = vmatmul.msk.f32.vlgmr.msrb.gmra.mxu0 %vm279_vm0, %v1453_v14  ;;  %1456 = vmatmul.msk.f32.vlgmr.msrb.gmra.mxu1 %vm279_vm0, %v1455_v15  ;;  %v1494_v14 = vld [vmem:[%s1981_s3 + $0x60] sm:$0xff] }
  0x9d   : > { %1466 = vmatmul.msk.f32.vlgmr.msra.gmra.mxu2 %vm279_vm0, %v1465_v19  ;;  %632 = vmatpush.msrb.mxu0 %v611_v16  ;;  %v639_v15 = vld [vmem:[%s1982_s4] sm:$0xff] }
  0xa2   : > { %v583_v22 = vpop.permute.xlu0 %582  ;;  %v527_v23 = vpop.permute.xlu1 %526 }
  0xa3   : > { %604 = vmatpush.msra.mxu3 %v583_v22  ;;  %548 = vmatpush.msra.mxu1 %v527_v23 }
  0xa4   : > { %1462 = vmatmul.msk.f32.vlgmr.msra.gmra.mxu0 %vm279_vm0, %v1461_v20  ;;  %1468 = vmatmul.msk.f32.vlgmr.msra.gmra.mxu3 %vm279_vm0, %v1467_v21 }
  0xa5   : > { %1464 = vmatmul.msk.f32.vlgmr.msra.gmra.mxu1 %vm279_vm0, %v1463_v24 }
  0xac   : > { %1470 = vmatmul.msk.f32.vlgmr.msrb.gmra.mxu0 %vm279_vm0, %v1469_v25 }
 0x10f   : > { %v356_v27 = vpop.f32.mrf.mxu2  ;;  %v384_v31 = vpop.f32.mrf.mxu3 }
 0x111   : > { %v300_v28 = vpop.f32.mrf.mxu0  ;;  %v328_v29 = vpop.f32.mrf.mxu1 }
 0x112   : > { %v303_v30 = vadd.f32 %v300_v28, %v275_v26 }
 0x114   : > { %v331_v32 = vadd.f32 %v328_v29, %v303_v30 }
 0x116   : > { %v359_v33 = vadd.f32 %v356_v27, %v331_v32 }
 0x118   : > { %v387_v34 = vadd.f32 %v384_v31, %v359_v33  ;;  %v466_v35 = vpop.f32.mrf.mxu2 }
 0x119   : > { %v412_v36 = vpop.f32.mrf.mxu0  ;;  %v440_v37 = vpop.f32.mrf.mxu1 }
 0x11a   : > { %v415_v38 = vadd.f32 %v412_v36, %v387_v34  ;;  %v494_v40 = vpop.f32.mrf.mxu3 }
 0x11c   : > { %v443_v39 = vadd.f32 %v440_v37, %v415_v38 }
 0x11e   : > { %v469_v41 = vadd.f32 %v466_v35, %v443_v39 }
 0x120   : > { %v497_v42 = vadd.f32 %v494_v40, %v469_v41  ;;  %v578_v46 = vpop.f32.mrf.mxu2 }
 0x121   : > { %v522_v43 = vpop.f32.mrf.mxu0 }
 0x122   : > { %v525_v44 = vadd.f32 %v522_v43, %v497_v42  ;;  %v550_v45 = vpop.f32.mrf.mxu1 }
 0x124   : > { %v553_v47 = vadd.f32 %v550_v45, %v525_v44  ;;  %v1501_v44 = vld [vmem:[%s1983_s5 + $0x18] sm:$0xff] }
 0x126   : > { %v581_v48 = vadd.f32 %v578_v46, %v553_v47  ;;  %v1509_v46 = vld [vmem:[%s1983_s5 + $0x38] sm:$0xff] }
 0x127   : > { %v606_v49 = vpop.f32.mrf.mxu3 }
 0x128   : > { %v609_v50 = vadd.f32 %v606_v49, %v581_v48  ;;  %v1497_v48 = vld [vmem:[%s1983_s5 + $0x8] sm:$0xff] }
 0x129   : > { %v634_v51 = vpop.f32.mrf.mxu0 }
 0x12a   : > { %v637_v52 = vadd.f32 %v634_v51, %v609_v50  ;;  %v1517_v51 = vld [vmem:[%s1983_s5 + $0x58] sm:$0xff] }
 0x12c   : > { %v638_v53 = vmax.f32 %v637_v52, 0.0 }
 0x12e   : > { %640 = vrot.lane.b32.xlu2 %v638_v53, %s2001_s21  ;;  %695 = vrot.lane.b32.xlu1 %v638_v53, %s1998_s18  ;;  %s2016_s18 = smov 1  }
 0x12f   : > { %667 = vrot.lane.b32.xlu0 %v638_v53, %s2002_s22  ;;  %s2013_s22 = smov 5  }
 0x136   : > { %751 = vrot.lane.b32.xlu2 %v638_v53, %s2003_s20  ;;  %723 = vrot.lane.b32.xlu1 %v638_v53, %s2000_s19  ;;  %s2012_s20 = smov 2   ;;  %s267_s19 = sand.u32 1, %s1630_s25  }
 0x137   : > { %779 = vrot.lane.b32.xlu0 %v638_v53, %s1999_s29  ;;  %s2017_s29 = smov 4   ;;  %s1444_s21 = sshll.u32 %s267_s19, 3 }
 0x13e   : > { %917 = vrot.lane.b32.xlu2 %v638_v53, %s2006_s9  ;;  %833 = vrot.lane.b32.xlu1 %v638_v53, %s2007_s13 }
 0x13f   : > { %889 = vrot.lane.b32.xlu0 %v638_v53, %s2008_s16 }
 0x146   : > { %973 = vrot.lane.b32.xlu2 %v638_v53, %s2009_s17  ;;  %945 = vrot.lane.b32.xlu1 %v638_v53, %s2010_s14 }
 0x147   : > { %861 = vrot.lane.b32.xlu0 %v638_v53, %s2011_s15 }
 0x188   : > { %v641_v54 = vpop.permute.xlu2 %640 }
 0x189   : > { %661 = vmatpush.msrb.mxu1 %v641_v54  ;;  %v1505_v54 = vld [vmem:[%s1983_s5 + $0x28] sm:$0xff] }
 0x18a   : > { %1471 = vmatmul.msk.f32.vlgmr.msrb.gmra.mxu1 %vm279_vm0, %v642_v55 }
 0x190   : > { %v752_v56 = vpop.permute.xlu2 %751 }
 0x191   : > { %773 = vmatpush.msra.mxu1 %v752_v56 }
 0x192   : > { %1479 = vmatmul.msk.f32.vlgmr.msra.gmra.mxu1 %vm279_vm0, %v1478_v57  ;;  %v1503_v57 = vld [vmem:[%s1983_s5 + $0x20] sm:$0xff] }
 0x198   : > { %v918_v62 = vpop.permute.xlu2 %917 }
 0x1a0   : > { %v696_v58 = vpop.permute.xlu1 %695  ;;  %v974_v13 = vpop.permute.xlu2 %973 }
 0x1a1   : > { %v668_v61 = vpop.permute.xlu0 %667  ;;  %717 = vmatpush.msrb.mxu3 %v696_v58  ;;  %v1499_v58 = vld [vmem:[%s1983_s5 + $0x10] sm:$0xff] }
 0x1a2   : > { %689 = vmatpush.msrb.mxu2 %v668_v61  ;;  %1475 = vmatmul.msk.f32.vlgmr.msrb.gmra.mxu3 %vm279_vm0, %v1474_v59  ;;  %v1513_v59 = vld [vmem:[%s1983_s5 + $0x48] sm:$0xff] }
 0x1a3   : > { %827 = vmatpush.msra.mxu3 %v638_v53  ;;  %1473 = vmatmul.msk.f32.vlgmr.msrb.gmra.mxu2 %vm279_vm0, %v1472_v60  ;;  %v1005_v53 = vld [vmem:[%s1983_s5] sm:$0xff] }
 0x1a5   : > { %939 = vmatpush.msrb.mxu3 %v918_v62  ;;  %v1511_v62 = vld [vmem:[%s1983_s5 + $0x40] sm:$0xff] }
 0x1a8   : > { %v724_v0 = vpop.permute.xlu1 %723 }
 0x1a9   : > { %v780_v3 = vpop.permute.xlu0 %779  ;;  %745 = vmatpush.msra.mxu0 %v724_v0 }
 0x1aa   : > { %801 = vmatpush.msra.mxu2 %v780_v3  ;;  %1477 = vmatmul.msk.f32.vlgmr.msra.gmra.mxu0 %vm279_vm0, %v1476_v63  ;;  %v1507_v63 = vld [vmem:[%s1983_s5 + $0x30] sm:$0xff] }
 0x1ab   : > { %1481 = vmatmul.msk.f32.vlgmr.msra.gmra.mxu2 %vm279_vm0, %v1480_v1  ;;  %1483 = vmatmul.msk.f32.vlgmr.msra.gmra.mxu3 %vm279_vm0, %v1482_v2  ;;  %v1519_v2 = vld [vmem:[%s1983_s5 + $0x60] sm:$0xff]  ;;  %v1515_v3 = vld [vmem:[%s1983_s5 + $0x50] sm:$0xff] }
 0x1b0   : > { %v834_v5 = vpop.permute.xlu1 %833 }
 0x1b1   : > { %v890_v8 = vpop.permute.xlu0 %889  ;;  %855 = vmatpush.msrb.mxu0 %v834_v5 }
 0x1b2   : > { %911 = vmatpush.msrb.mxu2 %v890_v8  ;;  %1485 = vmatmul.msk.f32.vlgmr.msrb.gmra.mxu0 %vm279_vm0, %v1484_v4  ;;  %v1002_v4 = vld [vmem:[%s1984_s6] sm:$0xff] }
 0x1b3   : > { %1489 = vmatmul.msk.f32.vlgmr.msrb.gmra.mxu2 %vm279_vm0, %v1488_v6  ;;  %1491 = vmatmul.msk.f32.vlgmr.msrb.gmra.mxu3 %vm279_vm0, %v1490_v7 }
 0x1b8   : > { %v946_v10 = vpop.permute.xlu1 %945 }
 0x1b9   : > { %v862_v12 = vpop.permute.xlu0 %861  ;;  %967 = vmatpush.msra.mxu0 %v946_v10 }
 0x1ba   : > { %883 = vmatpush.msrb.mxu1 %v862_v12  ;;  %1493 = vmatmul.msk.f32.vlgmr.msra.gmra.mxu0 %vm279_vm0, %v1492_v9 }
 0x1bb   : > { %1487 = vmatmul.msk.f32.vlgmr.msrb.gmra.mxu1 %vm279_vm0, %v1486_v11 }
 0x1bc   : > { %995 = vmatpush.msra.mxu1 %v974_v13 }
 0x1c3   : > { %1495 = vmatmul.msk.f32.vlgmr.msra.gmra.mxu1 %vm279_vm0, %v1494_v14 }
 0x207   : > { %v663_v16 = vpop.f32.mrf.mxu1 }
 0x208   : > { %v666_v17 = vadd.f32 %v663_v16, %v639_v15 }
 0x20f   : > { %v775_v23 = vpop.f32.mrf.mxu1 }
 0x225   : > { %v719_v19 = vpop.f32.mrf.mxu3 }
 0x226   : > { %v691_v18 = vpop.f32.mrf.mxu2 }
 0x227   : > { %v694_v20 = vadd.f32 %v691_v18, %v666_v17  ;;  %v747_v21 = vpop.f32.mrf.mxu0 }
 0x229   : > { %v722_v22 = vadd.f32 %v719_v19, %v694_v20 }
 0x22b   : > { %v750_v24 = vadd.f32 %v747_v21, %v722_v22 }
 0x22d   : > { %v778_v25 = vadd.f32 %v775_v23, %v750_v24 }
 0x22e   : > { %v803_v26 = vpop.f32.mrf.mxu2  ;;  %v829_v27 = vpop.f32.mrf.mxu3 }
 0x22f   : > { %v806_v28 = vadd.f32 %v803_v26, %v778_v25  ;;  %v857_v30 = vpop.f32.mrf.mxu0 }
 0x231   : > { %v832_v29 = vadd.f32 %v829_v27, %v806_v28 }
 0x233   : > { %v860_v31 = vadd.f32 %v857_v30, %v832_v29 }
 0x236   : > { %v913_v33 = vpop.f32.mrf.mxu2  ;;  %v941_v35 = vpop.f32.mrf.mxu3 }
 0x237   : > { %v969_v37 = vpop.f32.mrf.mxu0 }
 0x238   : > { %v885_v32 = vpop.f32.mrf.mxu1 }
 0x239   : > { %v888_v34 = vadd.f32 %v885_v32, %v860_v31 }
 0x23b   : > { %v916_v36 = vadd.f32 %v913_v33, %v888_v34 }
 0x23d   : > { %v944_v38 = vadd.f32 %v941_v35, %v916_v36 }
 0x23f   : > { %v972_v39 = vadd.f32 %v969_v37, %v944_v38 }
 0x240   : > { %v997_v40 = vpop.f32.mrf.mxu1 }
 0x241   : > { %v1000_v41 = vadd.f32 %v997_v40, %v972_v39 }
 0x243   : > { %v1001_v42 = vmax.f32 %v1000_v41, 0.0 }
 0x245   : > { %1114 = vrot.lane.b32.xlu2 %v1001_v42, %s2012_s20  ;;  %1030 = vrot.lane.b32.xlu1 %v1001_v42, %s2013_s22 }
 0x246   : > { %1003 = vrot.lane.b32.xlu0 %v1001_v42, %s2014_s23 }
 0x24d   : > { %1086 = vrot.lane.b32.xlu2 %v1001_v42, %s2015_s8  ;;  %1142 = vrot.lane.b32.xlu1 %v1001_v42, %s2016_s18 }
 0x24e   : > { %1058 = vrot.lane.b32.xlu0 %v1001_v42, %s2017_s29  ;;  %s1596_s29 = scalar_lea.hbm %s1985_s7, 16 }
 0x255   : > { %1196 = vrot.lane.b32.xlu2 %v1001_v42, %s2007_s13  ;;  %1252 = vrot.lane.b32.xlu1 %v1001_v42, %s2008_s16  ;;  %s1522_s13 = sshll.u32 %s1713_s28, 3  ;;  %s1366_s28 = scalar_lea.sflag [#allocation3], %s267_s19 }
 0x256   : > { %1224 = vrot.lane.b32.xlu0 %v1001_v42, %s2011_s15  ;;  %s1376_s16 = scalar_lea.hbm %s1985_s7, %s1522_s13 }
 0x257   : > { %s1380_s15 = sshll.u32 %s1376_s16, 4  ;;  %s1381_s15 = int_to_ptr.hbm [resolvable:$true] %s1380_s15 }
 0x258   : > { %s1590_s22 = sshra.s32 %s1381_s15, 4  ;;  %s1591_s22 = int_to_ptr.hbm [resolvable:$true] %s1590_s22 }
 0x259   : > { %s1592_s23 = scalar_lea.hbm %s1591_s22, 8  ;;  %p1597_p0 = scmp.lt.s32.totalorder %s1591_s22, %s1985_s7 }
 0x25a   : > { %p1593_p11 = scmp.ne.s32.totalorder %s1591_s22, %s1592_s23  ;;  %p1598_p1 = scmp.lt.s32.totalorder %s1596_s29, %s1592_s23 }
 0x25c   : > { %p1594_p12 = pnand %p1593_p11, %p1730_p5  ;;  %p1599_p2 = por %p1598_p1, %p1597_p0 }
 0x25d   : > { %1308 = vrot.lane.b32.xlu2 %v1001_v42, %s2010_s14  ;;  %1280 = vrot.lane.b32.xlu1 %v1001_v42, %s2006_s9 }
 0x25e   : > { %1336 = vrot.lane.b32.xlu0 %v1001_v42, %s2009_s17  ;;  %s269_s17 = scalar_lea.vmem [#allocation2], %s1444_s21  ;;  %p1595_p13 = pneg %p1594_p12 }
 0x25f   : > { %s1378_s14 = sshll.u32 %s269_s17, 4  ;;  %s1379_s14 = int_to_ptr.vmem [resolvable:$true] %s1378_s14 }
 0x260   : > { %p1600_p3 = pnand %p1599_p2, %p1595_p13 }
 0x29f   : > { %v1115_v43 = vpop.permute.xlu2 %1114 }
 0x2a7   : > { %v1087_v45 = vpop.permute.xlu2 %1086 }
 0x2a8   : > { %1108 = vmatpush.msrb.mxu1 %v1087_v45 }
 0x2a9   : > { %1502 = vmatmul.msk.f32.vlgmr.msrb.gmra.mxu1 %vm279_vm0, %v1501_v44 }
 0x2af   : > { %v1197_v47 = vpop.permute.xlu2 %1196 }
 0x2b0   : > { %1218 = vmatpush.msra.mxu1 %v1197_v47 }
 0x2b1   : > { %1510 = vmatmul.msk.f32.vlgmr.msra.gmra.mxu1 %vm279_vm0, %v1509_v46 }
 0x2b7   : > { %v1309_v49 = vpop.permute.xlu2 %1308  ;;  %v1031_v50 = vpop.permute.xlu1 %1030 }
 0x2b8   : > { %v1004_v52 = vpop.permute.xlu0 %1003  ;;  %1052 = vmatpush.msra.mxu3 %v1031_v50  ;;  %1330 = vmatpush.msrb.mxu1 %v1309_v49 }
 0x2b9   : > { %1024 = vmatpush.msra.mxu2 %v1004_v52  ;;  %1498 = vmatmul.msk.f32.vlgmr.msra.gmra.mxu3 %vm279_vm0, %v1497_v48 }
 0x2ba   : > { %1518 = vmatmul.msk.f32.vlgmr.msrb.gmra.mxu1 %vm279_vm0, %v1517_v51  ;;  %1496 = vmatmul.msk.f32.vlgmr.msra.gmra.mxu2 %vm279_vm0, %v1005_v53 }
 0x2bb   : > { %1136 = vmatpush.msrb.mxu2 %v1115_v43 }
 0x2bf   : > { %v1143_v55 = vpop.permute.xlu1 %1142 }
 0x2c0   : > { %v1059_v56 = vpop.permute.xlu0 %1058  ;;  %1164 = vmatpush.msrb.mxu3 %v1143_v55 }
 0x2c1   : > { %1080 = vmatpush.msrb.mxu0 %v1059_v56  ;;  %1506 = vmatmul.msk.f32.vlgmr.msrb.gmra.mxu3 %vm279_vm0, %v1505_v54 }
 0x2c2   : > { %1504 = vmatmul.msk.f32.vlgmr.msrb.gmra.mxu2 %vm279_vm0, %v1503_v57  ;;  %1500 = vmatmul.msk.f32.vlgmr.msrb.gmra.mxu0 %vm279_vm0, %v1499_v58 }
 0x2c3   : > { %1190 = vmatpush.msra.mxu0 %v1001_v42 }
 0x2c7   : > { %v1253_v60 = vpop.permute.xlu1 %1252 }
 0x2c8   : > { %v1225_v61 = vpop.permute.xlu0 %1224  ;;  %1274 = vmatpush.msra.mxu3 %v1253_v60 }
 0x2c9   : > { %1246 = vmatpush.msra.mxu2 %v1225_v61  ;;  %1514 = vmatmul.msk.f32.vlgmr.msra.gmra.mxu3 %vm279_vm0, %v1513_v59 }
 0x2ca   : > { %1512 = vmatmul.msk.f32.vlgmr.msra.gmra.mxu2 %vm279_vm0, %v1511_v62  ;;  %1508 = vmatmul.msk.f32.vlgmr.msra.gmra.mxu0 %vm279_vm0, %v1507_v63 }
 0x2cf   : > { %v1281_v0 = vpop.permute.xlu1 %1280 }
 0x2d0   : > { %v1337_v1 = vpop.permute.xlu0 %1336  ;;  %1302 = vmatpush.msrb.mxu0 %v1281_v0 }
 0x2d1   : > { %1358 = vmatpush.msrb.mxu2 %v1337_v1 }
 0x2d2   : > { %1520 = vmatmul.msk.f32.vlgmr.msrb.gmra.mxu2 %vm279_vm0, %v1519_v2  ;;  %1516 = vmatmul.msk.f32.vlgmr.msrb.gmra.mxu0 %vm279_vm0, %v1515_v3 }
 0x326   : > { %v1110_v7 = vpop.f32.mrf.mxu1 }
 0x32e   : > { %v1220_v17 = vpop.f32.mrf.mxu1 }
 0x337   : > { %v1332_v26 = vpop.f32.mrf.mxu1 }
 0x33c   : > { %v1054_v5 = vpop.f32.mrf.mxu3 }
 0x33d   : > { %v1026_v6 = vpop.f32.mrf.mxu2 }
 0x33e   : > { %v1029_v8 = vadd.f32 %v1026_v6, %v1002_v4 }
 0x33f   : > { %v1082_v9 = vpop.f32.mrf.mxu0 }
 0x340   : > { %v1057_v10 = vadd.f32 %v1054_v5, %v1029_v8 }
 0x342   : > { %v1085_v11 = vadd.f32 %v1082_v9, %v1057_v10 }
 0x344   : > { %v1166_v12 = vpop.f32.mrf.mxu3  ;;  %v1113_v13 = vadd.f32 %v1110_v7, %v1085_v11 }
 0x345   : > { %v1138_v14 = vpop.f32.mrf.mxu2 }
 0x346   : > { %v1141_v15 = vadd.f32 %v1138_v14, %v1113_v13 }
 0x347   : > { %v1192_v16 = vpop.f32.mrf.mxu0 }
 0x348   : > { %v1169_v18 = vadd.f32 %v1166_v12, %v1141_v15 }
 0x34a   : > { %v1195_v19 = vadd.f32 %v1192_v16, %v1169_v18 }
 0x34c   : > { %v1223_v20 = vadd.f32 %v1220_v17, %v1195_v19  ;;  %v1276_v22 = vpop.f32.mrf.mxu3 }
 0x34d   : > { %v1248_v21 = vpop.f32.mrf.mxu2 }
 0x34e   : > { %v1251_v23 = vadd.f32 %v1248_v21, %v1223_v20 }
 0x34f   : > { %v1304_v24 = vpop.f32.mrf.mxu0 }
 0x350   : > { %v1279_v25 = vadd.f32 %v1276_v22, %v1251_v23 }
 0x352   : > { %v1307_v27 = vadd.f32 %v1304_v24, %v1279_v25 }
 0x354   : > { %v1335_v28 = vadd.f32 %v1332_v26, %v1307_v27 }
 0x355   : > { %v1360_v29 = vpop.f32.mrf.mxu2 }
 0x356   : > { %v1363_v30 = vadd.f32 %v1360_v29, %v1335_v28 }
 0x358   : > { %1364 = vst [vmem:[%s269_s17] sm:$0xff] %v1363_v30 }
 0x359   : > { %1603 = shalt.err (!%p1600_p3)
}
 0x35a   : > { %1525 = dma.vmem_to_hbm [thread:$0]  (%p1730_p5), %s1379_s14, 128, %s1381_s15, %s1366_s28  }
 0x35b PF: > { %p1531_p4 = scmp.ge.s32.totalorder %s1638_s27, 2  ;;  %s1392_s19 = sand.u32 1, %s1626_s24  }
 0x35c   : > { %s1393_s20 = scalar_lea.sflag [#allocation3], %s1392_s19 }
 0x35d   : > { %p1528_p7 = pnand %p1531_p4, %p1734_p6 }
 0x35f   : > { %p1529_p8 = pneg %p1528_p7 }
 0x361   : > { %1621 = dma.done.wait (%p1529_p8), %s1393_s20, 128  }
 0x362   : > { %1623 = vsyncadd (%p1529_p8), %s1393_s20, 4294967168  ;;  %p17_p9 = scmp.ge.s32.totalorder %s1717_s30, 4   ;;  %s2018_s24 = smov %s1630_s25 }
 0x363   : > { %s2019_s25 = smov %s1634_s26  ;;  %s2020_s26 = smov %s1728_s10 }
 0x364   : > { %s2021_s27 = smov %s1717_s30  ;;  %19 = sbr.rel (!%p17_p9) target bundleno = 3 (0x3), region = 119 }
 0x369   :  { %1399 = vsyncpa [#allocation3], 1 }
 0x36a   :  { %1401 = vsyncpa [#allocation3 + $0x1], 1 }

</bundles_post_ra>
